<compile_context>
chip_gen: v5e
topology: v5e:2x2
jax: 0.10.0
libtpu: 0.0.40
codegen_flags: <defaults>
</compile_context>

<pallas_src>
import functools

import jax
import jax.numpy as jnp
from jax import lax
from jax.experimental import pallas as pl
from jax.experimental.pallas import tpu as pltpu


# ----------------------------------------------------------------------------
# Plain-JAX glue: sampling / grouping (gather/sort heavy, not the MXU hot path)
# ----------------------------------------------------------------------------
def square_distance(src, dst):
    # src: [B, N, C], dst: [B, M, C] -> [B, N, M]
    dist = -2.0 * jnp.einsum("bnc,bmc->bnm", src, dst)
    dist = dist + jnp.sum(src**2, axis=-1)[:, :, None]
    dist = dist + jnp.sum(dst**2, axis=-1)[:, None, :]
    return dist


def index_points(points, idx):
    # points: [B, N, C], idx: [B, ...] -> [B, ..., C]
    B = points.shape[0]
    C = points.shape[-1]
    flat = idx.reshape(B, -1)
    out = jnp.take_along_axis(points, flat[..., None], axis=1)
    return out.reshape(idx.shape + (C,))


def farthest_point_sample(xyz, npoint, key):
    # xyz: [B, N, 3] -> [B, npoint] int32
    B, N, _ = xyz.shape
    farthest = jax.random.randint(key, (B,), 0, N, dtype=jnp.int32)
    distance = jnp.full((B, N), 1e10, dtype=jnp.float32)
    centroids = jnp.zeros((B, npoint), dtype=jnp.int32)

    def body(i, carry):
        centroids, distance, farthest = carry
        centroids = centroids.at[:, i].set(farthest)
        centroid = jnp.take_along_axis(xyz, farthest[:, None, None], axis=1)
        dist = jnp.sum((xyz - centroid) ** 2, axis=-1)
        distance = jnp.minimum(distance, dist)
        farthest = jnp.argmax(distance, axis=-1).astype(jnp.int32)
        return centroids, distance, farthest

    centroids, _, _ = lax.fori_loop(0, npoint, body, (centroids, distance, farthest))
    return centroids


def query_ball_point(radius, nsample, xyz, new_xyz):
    # xyz: [B, N, 3], new_xyz: [B, S, 3] -> [B, S, nsample] int32
    # If no point falls inside the radius the sentinel N survives sort and the
    # first-column replacement mirrors the PyTorch reference exactly.
    B, N, _ = xyz.shape
    S = new_xyz.shape[1]
    sqrdists = square_distance(new_xyz, xyz)  # [B, S, N]
    group_idx = jnp.broadcast_to(jnp.arange(N, dtype=jnp.int32), (B, S, N))
    group_idx = jnp.where(sqrdists > radius**2, N, group_idx)
    group_idx = jnp.sort(group_idx, axis=-1)[:, :, :nsample]
    group_first = group_idx[:, :, :1]
    group_idx = jnp.where(group_idx == N, group_first, group_idx)
    # Clamp the degenerate sentinel (all points outside radius) to a valid row.
    group_idx = jnp.minimum(group_idx, N - 1)
    return group_idx


# ----------------------------------------------------------------------------
# Pallas kernel: fused multi-scale (1x1 conv -> BN(eval) -> ReLU)* + max over K
# ----------------------------------------------------------------------------
def _make_fused_kernel(n_layers_per_scale, c_offsets):
    """Kernel over refs laid out as
       [x_0, w_00, b_00, w_01, b_01, ..., x_1, w_10, b_10, ..., out_ref].
    x_i block: (1, K_i, Cin_i, TS) bf16; w: (Cout, Cin) bf16; b: (Cout, 1) f32.
    out block: (1, c_total, TS) f32 — lane axis is the point tile TS."""

    def kernel(*refs):
        out_ref = refs[-1]
        pos = 0
        for i, n_layers in enumerate(n_layers_per_scale):
            x_ref = refs[pos]
            pos += 1
            wb = refs[pos:pos + 2 * n_layers]
            pos += 2 * n_layers

            K = x_ref.shape[1]
            TS = x_ref.shape[-1]

            # Hoist weight/bias loads and the bias lane-broadcast out of the
            # K loop (JAX does not CSE broadcast_in_dim inside unrolled loops).
            ws = []
            bs = []
            for j in range(n_layers):
                w = wb[2 * j][...]                     # (Cout_j, Cin_j) bf16
                b = wb[2 * j + 1][...]                 # (Cout_j, 1)     f32
                ws.append(w)
                bs.append(jnp.broadcast_to(b, (w.shape[0], TS)))

            acc = None
            for k in range(K):                         # static, small unroll
                h = x_ref[0, k]                        # (Cin, TS) bf16
                for j in range(n_layers):
                    h = jnp.dot(ws[j], h, preferred_element_type=jnp.float32)
                    h = jnp.maximum(h + bs[j], 0.0)    # BN(eval) folded + ReLU
                    if j < n_layers - 1:
                        h = h.astype(jnp.bfloat16)     # bf16 MXU in, f32 acc
                acc = h if acc is None else jnp.maximum(acc, h)

            # Lane-dense store of this scale's channel block.
            out_ref[0, c_offsets[i]:c_offsets[i + 1], :] = acc

    return kernel


def _pick_point_tile(S, grouped_list, c_total, budget_bytes=40 * 1024 * 1024):
    """Largest lane tile in {512,256,128} dividing S that fits the VMEM budget
    (double-buffered inputs + output); else the whole S."""
    candidates = [c for c in (512, 256, 128) if S % c == 0]
    if not candidates:
        return S
    for ts in candidates:
        per_step = 0
        for g in grouped_list:
            _, K, Cin, _ = g.shape
            per_step += K * Cin * ts * 2          # bf16 grouped block
        per_step += c_total * ts * 4              # f32 output block
        if 2 * per_step <= budget_bytes:          # double buffering
            return ts
    return candidates[-1]


def fused_mlp_max_pallas(grouped_list, params_list):
    """grouped_list[i]: [B, K_i, Cin_i, S] (bf16).
    params_list[i]: list of (W (Cout,Cin) bf16, b (Cout,1) f32), BN folded.
    Returns [B, sum(Cout_last_i), S] float32 (max over K already applied)."""
    B = grouped_list[0].shape[0]
    S = grouped_list[0].shape[-1]
    c_lasts = [layers[-1][0].shape[0] for layers in params_list]
    c_total = sum(c_lasts)
    c_offsets = [0]
    for c in c_lasts:
        c_offsets.append(c_offsets[-1] + c)

    TS = _pick_point_tile(S, grouped_list, c_total)

    in_specs = []
    args = []
    n_layers_per_scale = []
    for grouped, layers in zip(grouped_list, params_list):
        _, K, Cin, _ = grouped.shape
        in_specs.append(
            pl.BlockSpec((1, K, Cin, TS), lambda b, s: (b, 0, 0, s)))
        args.append(grouped)
        for (w, bias) in layers:
            in_specs.append(pl.BlockSpec(w.shape, lambda b, s: (0, 0)))
            in_specs.append(pl.BlockSpec(bias.shape, lambda b, s: (0, 0)))
            args.append(w)
            args.append(bias)
        n_layers_per_scale.append(len(layers))

    out_spec = pl.BlockSpec((1, c_total, TS), lambda b, s: (b, 0, s))
    kernel = _make_fused_kernel(tuple(n_layers_per_scale), tuple(c_offsets))

    return pl.pallas_call(
        kernel,
        out_shape=jax.ShapeDtypeStruct((B, c_total, S), jnp.float32),
        grid=(B, S // TS),
        in_specs=in_specs,
        out_specs=out_spec,
        compiler_params=pltpu.CompilerParams(
            dimension_semantics=("parallel", "parallel"),
            vmem_limit_bytes=48 * 1024 * 1024,
        ),
    )(*args)


# ----------------------------------------------------------------------------
# Parameter construction (deterministic, synthetic) with BN folded into conv
# ----------------------------------------------------------------------------
def init_params(key, in_channel, mlp_list, bn_eps=1e-5,
                compute_dtype=jnp.bfloat16):
    params = []
    for mlp in mlp_list:
        layers = []
        last_channel = in_channel + 3
        for out_channel in mlp:
            key, k_w, k_b, k_g, k_be = jax.random.split(key, 5)
            # Conv2d(last_channel, out_channel, 1) weight as (Cout, Cin).
            w = 0.1 * jax.random.normal(k_w, (out_channel, last_channel),
                                        jnp.float32)
            b = 0.1 * jax.random.normal(k_b, (out_channel,), jnp.float32)
            gamma = 1.0 + 0.05 * jax.random.normal(k_g, (out_channel,),
                                                   jnp.float32)
            beta = 0.05 * jax.random.normal(k_be, (out_channel,), jnp.float32)
            running_mean = jnp.zeros((out_channel,), jnp.float32)
            running_var = jnp.ones((out_channel,), jnp.float32)
            # Fold eval-mode BN into the conv.
            scale = gamma / jnp.sqrt(running_var + bn_eps)
            fused_w = (w * scale[:, None]).astype(compute_dtype)         # bf16
            fused_b = ((b - running_mean) * scale + beta)[:, None]       # f32
            layers.append((fused_w, fused_b))
            last_channel = out_channel
        params.append(layers)
    return params


# ----------------------------------------------------------------------------
# Full forward pass of PointNetSetAbstractionMsg
# ----------------------------------------------------------------------------
def pointnet_sa_msg_forward(xyz, points, params, npoint, radius_list,
                            nsample_list, fps_key):
    """xyz: [B, 3, N], points: [B, D, N] or None.
    Returns new_xyz [B, 3, S], new_points_concat [B, sum(Cout_last), S]."""
    xyz_t = jnp.transpose(xyz, (0, 2, 1))                  # [B, N, 3]
    points_t = None if points is None else jnp.transpose(points, (0, 2, 1))
    B, N, _ = xyz_t.shape
    S = npoint

    fps_idx = farthest_point_sample(xyz_t, S, fps_key)     # [B, S]
    new_xyz = index_points(xyz_t, fps_idx)                 # [B, S, 3]

    grouped_list = []
    for i, radius in enumerate(radius_list):
        K = nsample_list[i]
        group_idx = query_ball_point(radius, K, xyz_t, new_xyz)        # [B,S,K]
        grouped_xyz = index_points(xyz_t, group_idx)                   # [B,S,K,3]
        grouped_xyz = grouped_xyz - new_xyz[:, :, None, :]
        if points_t is not None:
            grouped_pts = index_points(points_t, group_idx)            # [B,S,K,D]
            grouped_pts = jnp.concatenate([grouped_pts, grouped_xyz], axis=-1)
        else:
            grouped_pts = grouped_xyz
        # Lane-dense layout for the kernel: [B, K, Cin, S]
        grouped = jnp.transpose(grouped_pts, (0, 2, 3, 1)).astype(jnp.bfloat16)
        grouped_list.append(grouped)

    # Hot path: one fused Pallas kernel for all scales; output is already the
    # PyTorch-convention concatenated [B, sum(Cout_last), S].
    new_points_concat = fused_mlp_max_pallas(grouped_list, params)

    new_xyz_out = jnp.transpose(new_xyz, (0, 2, 1))                    # [B,3,S]
    return new_xyz_out, new_points_concat


# ----------------------------------------------------------------------------
if __name__ == "__main__":
    # Module config (small, consistent with the PyTorch module's __init__)
    npoint = 8
    radius_list = [0.4, 0.8]
    nsample_list = [4, 8]
    in_channel = 4                      # D (feature channels, excluding xyz)
    mlp_list = [[8, 16], [8, 32]]

    B, N = 2, 32

    key = jax.random.PRNGKey(0)
    k_xyz, k_pts, k_params, k_fps = jax.random.split(key, 4)

    xyz = jax.random.uniform(k_xyz, (B, 3, N), jnp.float32)             # [B,3,N]
    points = jax.random.normal(k_pts, (B, in_channel, N), jnp.float32)  # [B,D,N]

    params = init_params(k_params, in_channel, mlp_list)

    fwd = jax.jit(functools.partial(
        pointnet_sa_msg_forward,
        npoint=npoint, radius_list=radius_list, nsample_list=nsample_list))

    new_xyz, new_points_concat = fwd(xyz, points, params, fps_key=k_fps)
    jax.block_until_ready((new_xyz, new_points_concat))

    assert new_xyz.shape == (B, 3, npoint), new_xyz.shape
    assert new_points_concat.shape == (B, sum(m[-1] for m in mlp_list), npoint), \
        new_points_concat.shape
    assert bool(jnp.all(jnp.isfinite(new_xyz)))
    assert bool(jnp.all(jnp.isfinite(new_points_concat)))

    print("KERNEL_OK")
</pallas_src>

<mosaic_0001>
module attributes {stable_mosaic.version = 11 : i64} {
  func.func @kernel(%arg0: i32, %arg1: i32, %arg2: memref<1x4x7x8xbf16, #tpu.memory_space<vmem>>, %arg3: memref<8x7xbf16, #tpu.memory_space<vmem>>, %arg4: memref<8x1xf32, #tpu.memory_space<vmem>>, %arg5: memref<16x8xbf16, #tpu.memory_space<vmem>>, %arg6: memref<16x1xf32, #tpu.memory_space<vmem>>, %arg7: memref<1x8x7x8xbf16, #tpu.memory_space<vmem>>, %arg8: memref<8x7xbf16, #tpu.memory_space<vmem>>, %arg9: memref<8x1xf32, #tpu.memory_space<vmem>>, %arg10: memref<32x8xbf16, #tpu.memory_space<vmem>>, %arg11: memref<32x1xf32, #tpu.memory_space<vmem>>, %arg12: memref<1x48x8xf32, #tpu.memory_space<vmem>>) attributes {dimension_semantics = [#tpu.dimension_semantics<parallel>, #tpu.dimension_semantics<parallel>], iteration_bounds = array<i64: 2, 1>, scalar_prefetch = 0 : i64, scratch_operands = 0 : i64, tpu.core_type = #tpu.core_type<tc>, window_params = [{transform_indices = @transform_0, window_bounds = array<i64: 1, 4, 7, 8>}, {pipeline_mode = #tpu.pipeline_mode<synchronous>, transform_indices = @transform_1, window_bounds = array<i64: 8, 7>}, {pipeline_mode = #tpu.pipeline_mode<synchronous>, transform_indices = @transform_2, window_bounds = array<i64: 8, 1>}, {pipeline_mode = #tpu.pipeline_mode<synchronous>, transform_indices = @transform_3, window_bounds = array<i64: 16, 8>}, {pipeline_mode = #tpu.pipeline_mode<synchronous>, transform_indices = @transform_4, window_bounds = array<i64: 16, 1>}, {transform_indices = @transform_5, window_bounds = array<i64: 1, 8, 7, 8>}, {pipeline_mode = #tpu.pipeline_mode<synchronous>, transform_indices = @transform_6, window_bounds = array<i64: 8, 7>}, {pipeline_mode = #tpu.pipeline_mode<synchronous>, transform_indices = @transform_7, window_bounds = array<i64: 8, 1>}, {pipeline_mode = #tpu.pipeline_mode<synchronous>, transform_indices = @transform_8, window_bounds = array<i64: 32, 8>}, {pipeline_mode = #tpu.pipeline_mode<synchronous>, transform_indices = @transform_9, window_bounds = array<i64: 32, 1>}, {transform_indices = @transform_10, window_bounds = array<i64: 1, 48, 8>}]} {
    %c0 = arith.constant 0 : index
    %c0_0 = arith.constant 0 : index
    %0 = vector.load %arg3[%c0, %c0_0] : memref<8x7xbf16, #tpu.memory_space<vmem>>, vector<8x7xbf16>
    %c0_1 = arith.constant 0 : index
    %c0_2 = arith.constant 0 : index
    %1 = vector.load %arg4[%c0_1, %c0_2] : memref<8x1xf32, #tpu.memory_space<vmem>>, vector<8x1xf32>
    %2 = vector.shape_cast %1 : vector<8x1xf32> to vector<8x1xf32>
    %3 = vector.broadcast %2 : vector<8x1xf32> to vector<8x8xf32>
    %c0_3 = arith.constant 0 : index
    %c0_4 = arith.constant 0 : index
    %4 = vector.load %arg5[%c0_3, %c0_4] : memref<16x8xbf16, #tpu.memory_space<vmem>>, vector<16x8xbf16>
    %c0_5 = arith.constant 0 : index
    %c0_6 = arith.constant 0 : index
    %5 = vector.load %arg6[%c0_5, %c0_6] : memref<16x1xf32, #tpu.memory_space<vmem>>, vector<16x1xf32>
    %6 = vector.shape_cast %5 : vector<16x1xf32> to vector<16x1xf32>
    %7 = vector.broadcast %6 : vector<16x1xf32> to vector<16x8xf32>
    %c0_7 = arith.constant 0 : index
    %c0_8 = arith.constant 0 : index
    %c0_9 = arith.constant 0 : index
    %c0_10 = arith.constant 0 : index
    %8 = vector.load %arg2[%c0_7, %c0_8, %c0_9, %c0_10] : memref<1x4x7x8xbf16, #tpu.memory_space<vmem>>, vector<1x1x7x8xbf16>
    %9 = vector.shape_cast %8 : vector<1x1x7x8xbf16> to vector<7x8xbf16>
    %cst = arith.constant dense<0.000000e+00> : vector<8x8xf32>
    %10 = tpu.matmul %0, %9, %cst {dimension_numbers = #tpu.dot_dimension_numbers<[1], [0], [0], [1], [0, 0, 1, 1], [], []>} : vector<8x7xbf16>, vector<7x8xbf16>, vector<8x8xf32> -> vector<8x8xf32>
    %11 = arith.addf %10, %3 : vector<8x8xf32>
    %cst_11 = arith.constant 0.000000e+00 : f32
    %12 = vector.broadcast %cst_11 : f32 to vector<8x8xf32>
    %13 = arith.maximumf %11, %12 : vector<8x8xf32>
    %14 = arith.truncf %13 : vector<8x8xf32> to vector<8x8xbf16>
    %cst_12 = arith.constant dense<0.000000e+00> : vector<16x8xf32>
    %15 = tpu.matmul %4, %14, %cst_12 {dimension_numbers = #tpu.dot_dimension_numbers<[1], [0], [0], [1], [0, 0, 1, 1], [], []>} : vector<16x8xbf16>, vector<8x8xbf16>, vector<16x8xf32> -> vector<16x8xf32>
    %16 = arith.addf %15, %7 : vector<16x8xf32>
    %cst_13 = arith.constant 0.000000e+00 : f32
    %17 = vector.broadcast %cst_13 : f32 to vector<16x8xf32>
    %18 = arith.maximumf %16, %17 : vector<16x8xf32>
    %c0_14 = arith.constant 0 : index
    %c1 = arith.constant 1 : index
    %c0_15 = arith.constant 0 : index
    %c0_16 = arith.constant 0 : index
    %19 = vector.load %arg2[%c0_14, %c1, %c0_15, %c0_16] : memref<1x4x7x8xbf16, #tpu.memory_space<vmem>>, vector<1x1x7x8xbf16>
    %20 = vector.shape_cast %19 : vector<1x1x7x8xbf16> to vector<7x8xbf16>
    %cst_17 = arith.constant dense<0.000000e+00> : vector<8x8xf32>
    %21 = tpu.matmul %0, %20, %cst_17 {dimension_numbers = #tpu.dot_dimension_numbers<[1], [0], [0], [1], [0, 0, 1, 1], [], []>} : vector<8x7xbf16>, vector<7x8xbf16>, vector<8x8xf32> -> vector<8x8xf32>
    %22 = arith.addf %21, %3 : vector<8x8xf32>
    %cst_18 = arith.constant 0.000000e+00 : f32
    %23 = vector.broadcast %cst_18 : f32 to vector<8x8xf32>
    %24 = arith.maximumf %22, %23 : vector<8x8xf32>
    %25 = arith.truncf %24 : vector<8x8xf32> to vector<8x8xbf16>
    %cst_19 = arith.constant dense<0.000000e+00> : vector<16x8xf32>
    %26 = tpu.matmul %4, %25, %cst_19 {dimension_numbers = #tpu.dot_dimension_numbers<[1], [0], [0], [1], [0, 0, 1, 1], [], []>} : vector<16x8xbf16>, vector<8x8xbf16>, vector<16x8xf32> -> vector<16x8xf32>
    %27 = arith.addf %26, %7 : vector<16x8xf32>
    %cst_20 = arith.constant 0.000000e+00 : f32
    %28 = vector.broadcast %cst_20 : f32 to vector<16x8xf32>
    %29 = arith.maximumf %27, %28 : vector<16x8xf32>
    %30 = arith.maximumf %18, %29 : vector<16x8xf32>
    %c0_21 = arith.constant 0 : index
    %c2 = arith.constant 2 : index
    %c0_22 = arith.constant 0 : index
    %c0_23 = arith.constant 0 : index
    %31 = vector.load %arg2[%c0_21, %c2, %c0_22, %c0_23] : memref<1x4x7x8xbf16, #tpu.memory_space<vmem>>, vector<1x1x7x8xbf16>
    %32 = vector.shape_cast %31 : vector<1x1x7x8xbf16> to vector<7x8xbf16>
    %cst_24 = arith.constant dense<0.000000e+00> : vector<8x8xf32>
    %33 = tpu.matmul %0, %32, %cst_24 {dimension_numbers = #tpu.dot_dimension_numbers<[1], [0], [0], [1], [0, 0, 1, 1], [], []>} : vector<8x7xbf16>, vector<7x8xbf16>, vector<8x8xf32> -> vector<8x8xf32>
    %34 = arith.addf %33, %3 : vector<8x8xf32>
    %cst_25 = arith.constant 0.000000e+00 : f32
    %35 = vector.broadcast %cst_25 : f32 to vector<8x8xf32>
    %36 = arith.maximumf %34, %35 : vector<8x8xf32>
    %37 = arith.truncf %36 : vector<8x8xf32> to vector<8x8xbf16>
    %cst_26 = arith.constant dense<0.000000e+00> : vector<16x8xf32>
    %38 = tpu.matmul %4, %37, %cst_26 {dimension_numbers = #tpu.dot_dimension_numbers<[1], [0], [0], [1], [0, 0, 1, 1], [], []>} : vector<16x8xbf16>, vector<8x8xbf16>, vector<16x8xf32> -> vector<16x8xf32>
    %39 = arith.addf %38, %7 : vector<16x8xf32>
    %cst_27 = arith.constant 0.000000e+00 : f32
    %40 = vector.broadcast %cst_27 : f32 to vector<16x8xf32>
    %41 = arith.maximumf %39, %40 : vector<16x8xf32>
    %42 = arith.maximumf %30, %41 : vector<16x8xf32>
    %c0_28 = arith.constant 0 : index
    %c3 = arith.constant 3 : index
    %c0_29 = arith.constant 0 : index
    %c0_30 = arith.constant 0 : index
    %43 = vector.load %arg2[%c0_28, %c3, %c0_29, %c0_30] : memref<1x4x7x8xbf16, #tpu.memory_space<vmem>>, vector<1x1x7x8xbf16>
    %44 = vector.shape_cast %43 : vector<1x1x7x8xbf16> to vector<7x8xbf16>
    %cst_31 = arith.constant dense<0.000000e+00> : vector<8x8xf32>
    %45 = tpu.matmul %0, %44, %cst_31 {dimension_numbers = #tpu.dot_dimension_numbers<[1], [0], [0], [1], [0, 0, 1, 1], [], []>} : vector<8x7xbf16>, vector<7x8xbf16>, vector<8x8xf32> -> vector<8x8xf32>
    %46 = arith.addf %45, %3 : vector<8x8xf32>
    %cst_32 = arith.constant 0.000000e+00 : f32
    %47 = vector.broadcast %cst_32 : f32 to vector<8x8xf32>
    %48 = arith.maximumf %46, %47 : vector<8x8xf32>
    %49 = arith.truncf %48 : vector<8x8xf32> to vector<8x8xbf16>
    %cst_33 = arith.constant dense<0.000000e+00> : vector<16x8xf32>
    %50 = tpu.matmul %4, %49, %cst_33 {dimension_numbers = #tpu.dot_dimension_numbers<[1], [0], [0], [1], [0, 0, 1, 1], [], []>} : vector<16x8xbf16>, vector<8x8xbf16>, vector<16x8xf32> -> vector<16x8xf32>
    %51 = arith.addf %50, %7 : vector<16x8xf32>
    %cst_34 = arith.constant 0.000000e+00 : f32
    %52 = vector.broadcast %cst_34 : f32 to vector<16x8xf32>
    %53 = arith.maximumf %51, %52 : vector<16x8xf32>
    %54 = arith.maximumf %42, %53 : vector<16x8xf32>
    %c0_35 = arith.constant 0 : index
    %c0_36 = arith.constant 0 : index
    %c0_37 = arith.constant 0 : index
    %55 = vector.load %arg12[%c0_35, %c0_36, %c0_37] : memref<1x48x8xf32, #tpu.memory_space<vmem>>, vector<1x16x8xf32>
    %56 = vector.shape_cast %55 : vector<1x16x8xf32> to vector<16x8xf32>
    %57 = vector.shape_cast %54 : vector<16x8xf32> to vector<1x16x8xf32>
    tpu.vector_store %arg12[%c0_35, %c0_36, %c0_37], %57 {strides = array<i32>} : memref<1x48x8xf32, #tpu.memory_space<vmem>>, vector<1x16x8xf32>,
    %c0_38 = arith.constant 0 : index
    %c0_39 = arith.constant 0 : index
    %58 = vector.load %arg8[%c0_38, %c0_39] : memref<8x7xbf16, #tpu.memory_space<vmem>>, vector<8x7xbf16>
    %c0_40 = arith.constant 0 : index
    %c0_41 = arith.constant 0 : index
    %59 = vector.load %arg9[%c0_40, %c0_41] : memref<8x1xf32, #tpu.memory_space<vmem>>, vector<8x1xf32>
    %60 = vector.shape_cast %59 : vector<8x1xf32> to vector<8x1xf32>
    %61 = vector.broadcast %60 : vector<8x1xf32> to vector<8x8xf32>
    %c0_42 = arith.constant 0 : index
    %c0_43 = arith.constant 0 : index
    %62 = vector.load %arg10[%c0_42, %c0_43] : memref<32x8xbf16, #tpu.memory_space<vmem>>, vector<32x8xbf16>
    %c0_44 = arith.constant 0 : index
    %c0_45 = arith.constant 0 : index
    %63 = vector.load %arg11[%c0_44, %c0_45] : memref<32x1xf32, #tpu.memory_space<vmem>>, vector<32x1xf32>
    %64 = vector.shape_cast %63 : vector<32x1xf32> to vector<32x1xf32>
    %65 = vector.broadcast %64 : vector<32x1xf32> to vector<32x8xf32>
    %c0_46 = arith.constant 0 : index
    %c0_47 = arith.constant 0 : index
    %c0_48 = arith.constant 0 : index
    %c0_49 = arith.constant 0 : index
    %66 = vector.load %arg7[%c0_46, %c0_47, %c0_48, %c0_49] : memref<1x8x7x8xbf16, #tpu.memory_space<vmem>>, vector<1x1x7x8xbf16>
    %67 = vector.shape_cast %66 : vector<1x1x7x8xbf16> to vector<7x8xbf16>
    %cst_50 = arith.constant dense<0.000000e+00> : vector<8x8xf32>
    %68 = tpu.matmul %58, %67, %cst_50 {dimension_numbers = #tpu.dot_dimension_numbers<[1], [0], [0], [1], [0, 0, 1, 1], [], []>} : vector<8x7xbf16>, vector<7x8xbf16>, vector<8x8xf32> -> vector<8x8xf32>
    %69 = arith.addf %68, %61 : vector<8x8xf32>
    %cst_51 = arith.constant 0.000000e+00 : f32
    %70 = vector.broadcast %cst_51 : f32 to vector<8x8xf32>
    %71 = arith.maximumf %69, %70 : vector<8x8xf32>
    %72 = arith.truncf %71 : vector<8x8xf32> to vector<8x8xbf16>
    %cst_52 = arith.constant dense<0.000000e+00> : vector<32x8xf32>
    %73 = tpu.matmul %62, %72, %cst_52 {dimension_numbers = #tpu.dot_dimension_numbers<[1], [0], [0], [1], [0, 0, 1, 1], [], []>} : vector<32x8xbf16>, vector<8x8xbf16>, vector<32x8xf32> -> vector<32x8xf32>
    %74 = arith.addf %73, %65 : vector<32x8xf32>
    %cst_53 = arith.constant 0.000000e+00 : f32
    %75 = vector.broadcast %cst_53 : f32 to vector<32x8xf32>
    %76 = arith.maximumf %74, %75 : vector<32x8xf32>
    %c0_54 = arith.constant 0 : index
    %c1_55 = arith.constant 1 : index
    %c0_56 = arith.constant 0 : index
    %c0_57 = arith.constant 0 : index
    %77 = vector.load %arg7[%c0_54, %c1_55, %c0_56, %c0_57] : memref<1x8x7x8xbf16, #tpu.memory_space<vmem>>, vector<1x1x7x8xbf16>
    %78 = vector.shape_cast %77 : vector<1x1x7x8xbf16> to vector<7x8xbf16>
    %cst_58 = arith.constant dense<0.000000e+00> : vector<8x8xf32>
    %79 = tpu.matmul %58, %78, %cst_58 {dimension_numbers = #tpu.dot_dimension_numbers<[1], [0], [0], [1], [0, 0, 1, 1], [], []>} : vector<8x7xbf16>, vector<7x8xbf16>, vector<8x8xf32> -> vector<8x8xf32>
    %80 = arith.addf %79, %61 : vector<8x8xf32>
    %cst_59 = arith.constant 0.000000e+00 : f32
    %81 = vector.broadcast %cst_59 : f32 to vector<8x8xf32>
    %82 = arith.maximumf %80, %81 : vector<8x8xf32>
    %83 = arith.truncf %82 : vector<8x8xf32> to vector<8x8xbf16>
    %cst_60 = arith.constant dense<0.000000e+00> : vector<32x8xf32>
    %84 = tpu.matmul %62, %83, %cst_60 {dimension_numbers = #tpu.dot_dimension_numbers<[1], [0], [0], [1], [0, 0, 1, 1], [], []>} : vector<32x8xbf16>, vector<8x8xbf16>, vector<32x8xf32> -> vector<32x8xf32>
    %85 = arith.addf %84, %65 : vector<32x8xf32>
    %cst_61 = arith.constant 0.000000e+00 : f32
    %86 = vector.broadcast %cst_61 : f32 to vector<32x8xf32>
    %87 = arith.maximumf %85, %86 : vector<32x8xf32>
    %88 = arith.maximumf %76, %87 : vector<32x8xf32>
    %c0_62 = arith.constant 0 : index
    %c2_63 = arith.constant 2 : index
    %c0_64 = arith.constant 0 : index
    %c0_65 = arith.constant 0 : index
    %89 = vector.load %arg7[%c0_62, %c2_63, %c0_64, %c0_65] : memref<1x8x7x8xbf16, #tpu.memory_space<vmem>>, vector<1x1x7x8xbf16>
    %90 = vector.shape_cast %89 : vector<1x1x7x8xbf16> to vector<7x8xbf16>
    %cst_66 = arith.constant dense<0.000000e+00> : vector<8x8xf32>
    %91 = tpu.matmul %58, %90, %cst_66 {dimension_numbers = #tpu.dot_dimension_numbers<[1], [0], [0], [1], [0, 0, 1, 1], [], []>} : vector<8x7xbf16>, vector<7x8xbf16>, vector<8x8xf32> -> vector<8x8xf32>
    %92 = arith.addf %91, %61 : vector<8x8xf32>
    %cst_67 = arith.constant 0.000000e+00 : f32
    %93 = vector.broadcast %cst_67 : f32 to vector<8x8xf32>
    %94 = arith.maximumf %92, %93 : vector<8x8xf32>
    %95 = arith.truncf %94 : vector<8x8xf32> to vector<8x8xbf16>
    %cst_68 = arith.constant dense<0.000000e+00> : vector<32x8xf32>
    %96 = tpu.matmul %62, %95, %cst_68 {dimension_numbers = #tpu.dot_dimension_numbers<[1], [0], [0], [1], [0, 0, 1, 1], [], []>} : vector<32x8xbf16>, vector<8x8xbf16>, vector<32x8xf32> -> vector<32x8xf32>
    %97 = arith.addf %96, %65 : vector<32x8xf32>
    %cst_69 = arith.constant 0.000000e+00 : f32
    %98 = vector.broadcast %cst_69 : f32 to vector<32x8xf32>
    %99 = arith.maximumf %97, %98 : vector<32x8xf32>
    %100 = arith.maximumf %88, %99 : vector<32x8xf32>
    %c0_70 = arith.constant 0 : index
    %c3_71 = arith.constant 3 : index
    %c0_72 = arith.constant 0 : index
    %c0_73 = arith.constant 0 : index
    %101 = vector.load %arg7[%c0_70, %c3_71, %c0_72, %c0_73] : memref<1x8x7x8xbf16, #tpu.memory_space<vmem>>, vector<1x1x7x8xbf16>
    %102 = vector.shape_cast %101 : vector<1x1x7x8xbf16> to vector<7x8xbf16>
    %cst_74 = arith.constant dense<0.000000e+00> : vector<8x8xf32>
    %103 = tpu.matmul %58, %102, %cst_74 {dimension_numbers = #tpu.dot_dimension_numbers<[1], [0], [0], [1], [0, 0, 1, 1], [], []>} : vector<8x7xbf16>, vector<7x8xbf16>, vector<8x8xf32> -> vector<8x8xf32>
    %104 = arith.addf %103, %61 : vector<8x8xf32>
    %cst_75 = arith.constant 0.000000e+00 : f32
    %105 = vector.broadcast %cst_75 : f32 to vector<8x8xf32>
    %106 = arith.maximumf %104, %105 : vector<8x8xf32>
    %107 = arith.truncf %106 : vector<8x8xf32> to vector<8x8xbf16>
    %cst_76 = arith.constant dense<0.000000e+00> : vector<32x8xf32>
    %108 = tpu.matmul %62, %107, %cst_76 {dimension_numbers = #tpu.dot_dimension_numbers<[1], [0], [0], [1], [0, 0, 1, 1], [], []>} : vector<32x8xbf16>, vector<8x8xbf16>, vector<32x8xf32> -> vector<32x8xf32>
    %109 = arith.addf %108, %65 : vector<32x8xf32>
    %cst_77 = arith.constant 0.000000e+00 : f32
    %110 = vector.broadcast %cst_77 : f32 to vector<32x8xf32>
    %111 = arith.maximumf %109, %110 : vector<32x8xf32>
    %112 = arith.maximumf %100, %111 : vector<32x8xf32>
    %c0_78 = arith.constant 0 : index
    %c4 = arith.constant 4 : index
    %c0_79 = arith.constant 0 : index
    %c0_80 = arith.constant 0 : index
    %113 = vector.load %arg7[%c0_78, %c4, %c0_79, %c0_80] : memref<1x8x7x8xbf16, #tpu.memory_space<vmem>>, vector<1x1x7x8xbf16>
    %114 = vector.shape_cast %113 : vector<1x1x7x8xbf16> to vector<7x8xbf16>
    %cst_81 = arith.constant dense<0.000000e+00> : vector<8x8xf32>
    %115 = tpu.matmul %58, %114, %cst_81 {dimension_numbers = #tpu.dot_dimension_numbers<[1], [0], [0], [1], [0, 0, 1, 1], [], []>} : vector<8x7xbf16>, vector<7x8xbf16>, vector<8x8xf32> -> vector<8x8xf32>
    %116 = arith.addf %115, %61 : vector<8x8xf32>
    %cst_82 = arith.constant 0.000000e+00 : f32
    %117 = vector.broadcast %cst_82 : f32 to vector<8x8xf32>
    %118 = arith.maximumf %116, %117 : vector<8x8xf32>
    %119 = arith.truncf %118 : vector<8x8xf32> to vector<8x8xbf16>
    %cst_83 = arith.constant dense<0.000000e+00> : vector<32x8xf32>
    %120 = tpu.matmul %62, %119, %cst_83 {dimension_numbers = #tpu.dot_dimension_numbers<[1], [0], [0], [1], [0, 0, 1, 1], [], []>} : vector<32x8xbf16>, vector<8x8xbf16>, vector<32x8xf32> -> vector<32x8xf32>
    %121 = arith.addf %120, %65 : vector<32x8xf32>
    %cst_84 = arith.constant 0.000000e+00 : f32
    %122 = vector.broadcast %cst_84 : f32 to vector<32x8xf32>
    %123 = arith.maximumf %121, %122 : vector<32x8xf32>
    %124 = arith.maximumf %112, %123 : vector<32x8xf32>
    %c0_85 = arith.constant 0 : index
    %c5 = arith.constant 5 : index
    %c0_86 = arith.constant 0 : index
    %c0_87 = arith.constant 0 : index
    %125 = vector.load %arg7[%c0_85, %c5, %c0_86, %c0_87] : memref<1x8x7x8xbf16, #tpu.memory_space<vmem>>, vector<1x1x7x8xbf16>
    %126 = vector.shape_cast %125 : vector<1x1x7x8xbf16> to vector<7x8xbf16>
    %cst_88 = arith.constant dense<0.000000e+00> : vector<8x8xf32>
    %127 = tpu.matmul %58, %126, %cst_88 {dimension_numbers = #tpu.dot_dimension_numbers<[1], [0], [0], [1], [0, 0, 1, 1], [], []>} : vector<8x7xbf16>, vector<7x8xbf16>, vector<8x8xf32> -> vector<8x8xf32>
    %128 = arith.addf %127, %61 : vector<8x8xf32>
    %cst_89 = arith.constant 0.000000e+00 : f32
    %129 = vector.broadcast %cst_89 : f32 to vector<8x8xf32>
    %130 = arith.maximumf %128, %129 : vector<8x8xf32>
    %131 = arith.truncf %130 : vector<8x8xf32> to vector<8x8xbf16>
    %cst_90 = arith.constant dense<0.000000e+00> : vector<32x8xf32>
    %132 = tpu.matmul %62, %131, %cst_90 {dimension_numbers = #tpu.dot_dimension_numbers<[1], [0], [0], [1], [0, 0, 1, 1], [], []>} : vector<32x8xbf16>, vector<8x8xbf16>, vector<32x8xf32> -> vector<32x8xf32>
    %133 = arith.addf %132, %65 : vector<32x8xf32>
    %cst_91 = arith.constant 0.000000e+00 : f32
    %134 = vector.broadcast %cst_91 : f32 to vector<32x8xf32>
    %135 = arith.maximumf %133, %134 : vector<32x8xf32>
    %136 = arith.maximumf %124, %135 : vector<32x8xf32>
    %c0_92 = arith.constant 0 : index
    %c6 = arith.constant 6 : index
    %c0_93 = arith.constant 0 : index
    %c0_94 = arith.constant 0 : index
    %137 = vector.load %arg7[%c0_92, %c6, %c0_93, %c0_94] : memref<1x8x7x8xbf16, #tpu.memory_space<vmem>>, vector<1x1x7x8xbf16>
    %138 = vector.shape_cast %137 : vector<1x1x7x8xbf16> to vector<7x8xbf16>
    %cst_95 = arith.constant dense<0.000000e+00> : vector<8x8xf32>
    %139 = tpu.matmul %58, %138, %cst_95 {dimension_numbers = #tpu.dot_dimension_numbers<[1], [0], [0], [1], [0, 0, 1, 1], [], []>} : vector<8x7xbf16>, vector<7x8xbf16>, vector<8x8xf32> -> vector<8x8xf32>
    %140 = arith.addf %139, %61 : vector<8x8xf32>
    %cst_96 = arith.constant 0.000000e+00 : f32
    %141 = vector.broadcast %cst_96 : f32 to vector<8x8xf32>
    %142 = arith.maximumf %140, %141 : vector<8x8xf32>
    %143 = arith.truncf %142 : vector<8x8xf32> to vector<8x8xbf16>
    %cst_97 = arith.constant dense<0.000000e+00> : vector<32x8xf32>
    %144 = tpu.matmul %62, %143, %cst_97 {dimension_numbers = #tpu.dot_dimension_numbers<[1], [0], [0], [1], [0, 0, 1, 1], [], []>} : vector<32x8xbf16>, vector<8x8xbf16>, vector<32x8xf32> -> vector<32x8xf32>
    %145 = arith.addf %144, %65 : vector<32x8xf32>
    %cst_98 = arith.constant 0.000000e+00 : f32
    %146 = vector.broadcast %cst_98 : f32 to vector<32x8xf32>
    %147 = arith.maximumf %145, %146 : vector<32x8xf32>
    %148 = arith.maximumf %136, %147 : vector<32x8xf32>
    %c0_99 = arith.constant 0 : index
    %c7 = arith.constant 7 : index
    %c0_100 = arith.constant 0 : index
    %c0_101 = arith.constant 0 : index
    %149 = vector.load %arg7[%c0_99, %c7, %c0_100, %c0_101] : memref<1x8x7x8xbf16, #tpu.memory_space<vmem>>, vector<1x1x7x8xbf16>
    %150 = vector.shape_cast %149 : vector<1x1x7x8xbf16> to vector<7x8xbf16>
    %cst_102 = arith.constant dense<0.000000e+00> : vector<8x8xf32>
    %151 = tpu.matmul %58, %150, %cst_102 {dimension_numbers = #tpu.dot_dimension_numbers<[1], [0], [0], [1], [0, 0, 1, 1], [], []>} : vector<8x7xbf16>, vector<7x8xbf16>, vector<8x8xf32> -> vector<8x8xf32>
    %152 = arith.addf %151, %61 : vector<8x8xf32>
    %cst_103 = arith.constant 0.000000e+00 : f32
    %153 = vector.broadcast %cst_103 : f32 to vector<8x8xf32>
    %154 = arith.maximumf %152, %153 : vector<8x8xf32>
    %155 = arith.truncf %154 : vector<8x8xf32> to vector<8x8xbf16>
    %cst_104 = arith.constant dense<0.000000e+00> : vector<32x8xf32>
    %156 = tpu.matmul %62, %155, %cst_104 {dimension_numbers = #tpu.dot_dimension_numbers<[1], [0], [0], [1], [0, 0, 1, 1], [], []>} : vector<32x8xbf16>, vector<8x8xbf16>, vector<32x8xf32> -> vector<32x8xf32>
    %157 = arith.addf %156, %65 : vector<32x8xf32>
    %cst_105 = arith.constant 0.000000e+00 : f32
    %158 = vector.broadcast %cst_105 : f32 to vector<32x8xf32>
    %159 = arith.maximumf %157, %158 : vector<32x8xf32>
    %160 = arith.maximumf %148, %159 : vector<32x8xf32>
    %c0_106 = arith.constant 0 : index
    %c16 = arith.constant 16 : index
    %c0_107 = arith.constant 0 : index
    %161 = vector.load %arg12[%c0_106, %c16, %c0_107] : memref<1x48x8xf32, #tpu.memory_space<vmem>>, vector<1x32x8xf32>
    %162 = vector.shape_cast %161 : vector<1x32x8xf32> to vector<32x8xf32>
    %163 = vector.shape_cast %160 : vector<32x8xf32> to vector<1x32x8xf32>
    tpu.vector_store %arg12[%c0_106, %c16, %c0_107], %163 {strides = array<i32>} : memref<1x48x8xf32, #tpu.memory_space<vmem>>, vector<1x32x8xf32>,
    return
  }
  func.func @transform_0(%arg0: i32, %arg1: i32) -> (i32, i32, i32, i32) {
    %c0_i32 = arith.constant 0 : i32
    %c0_i32_0 = arith.constant 0 : i32
    %c0_i32_1 = arith.constant 0 : i32
    return %arg0, %c0_i32, %c0_i32_0, %arg1 : i32, i32, i32, i32
  }
  func.func @transform_1(%arg0: i32, %arg1: i32) -> (i32, i32) {
    %c0_i32 = arith.constant 0 : i32
    %c0_i32_0 = arith.constant 0 : i32
    %c0_i32_1 = arith.constant 0 : i32
    return %c0_i32, %c0_i32_0 : i32, i32
  }
  func.func @transform_2(%arg0: i32, %arg1: i32) -> (i32, i32) {
    %c0_i32 = arith.constant 0 : i32
    %c0_i32_0 = arith.constant 0 : i32
    %c0_i32_1 = arith.constant 0 : i32
    return %c0_i32, %c0_i32_0 : i32, i32
  }
  func.func @transform_3(%arg0: i32, %arg1: i32) -> (i32, i32) {
    %c0_i32 = arith.constant 0 : i32
    %c0_i32_0 = arith.constant 0 : i32
    %c0_i32_1 = arith.constant 0 : i32
    return %c0_i32, %c0_i32_0 : i32, i32
  }
  func.func @transform_4(%arg0: i32, %arg1: i32) -> (i32, i32) {
    %c0_i32 = arith.constant 0 : i32
    %c0_i32_0 = arith.constant 0 : i32
    %c0_i32_1 = arith.constant 0 : i32
    return %c0_i32, %c0_i32_0 : i32, i32
  }
  func.func @transform_5(%arg0: i32, %arg1: i32) -> (i32, i32, i32, i32) {
    %c0_i32 = arith.constant 0 : i32
    %c0_i32_0 = arith.constant 0 : i32
    %c0_i32_1 = arith.constant 0 : i32
    return %arg0, %c0_i32, %c0_i32_0, %arg1 : i32, i32, i32, i32
  }
  func.func @transform_6(%arg0: i32, %arg1: i32) -> (i32, i32) {
    %c0_i32 = arith.constant 0 : i32
    %c0_i32_0 = arith.constant 0 : i32
    %c0_i32_1 = arith.constant 0 : i32
    return %c0_i32, %c0_i32_0 : i32, i32
  }
  func.func @transform_7(%arg0: i32, %arg1: i32) -> (i32, i32) {
    %c0_i32 = arith.constant 0 : i32
    %c0_i32_0 = arith.constant 0 : i32
    %c0_i32_1 = arith.constant 0 : i32
    return %c0_i32, %c0_i32_0 : i32, i32
  }
  func.func @transform_8(%arg0: i32, %arg1: i32) -> (i32, i32) {
    %c0_i32 = arith.constant 0 : i32
    %c0_i32_0 = arith.constant 0 : i32
    %c0_i32_1 = arith.constant 0 : i32
    return %c0_i32, %c0_i32_0 : i32, i32
  }
  func.func @transform_9(%arg0: i32, %arg1: i32) -> (i32, i32) {
    %c0_i32 = arith.constant 0 : i32
    %c0_i32_0 = arith.constant 0 : i32
    %c0_i32_1 = arith.constant 0 : i32
    return %c0_i32, %c0_i32_0 : i32, i32
  }
  func.func @transform_10(%arg0: i32, %arg1: i32) -> (i32, i32, i32) {
    %c0_i32 = arith.constant 0 : i32
    %c0_i32_0 = arith.constant 0 : i32
    return %arg0, %c0_i32, %arg1 : i32, i32, i32
  }
}

</mosaic_0001>

<bundles_post_ra>
// kernel: custom-call.12
= control target key start
LH: loop header
LB: loop body
LE: loop exit
PB: predicated region body
PF: predicated region fallthrough
CT: control target
= control target key end

     0   :  { %s6_s0 = inlined_call_operand.vmem [shape: f32[2,32], index: 0, kind: output, shape index: {}]  }

// kernel: pointnet_sa_msg_forward.1
= control target key start
LH: loop header
LB: loop body
LE: loop exit
PB: predicated region body
PF: predicated region fallthrough
CT: control target
= control target key end

     0   :  { %s1360_s13 = smov 0   ;;  %s1362_s14 = smov 0   ;;  %s1606_s0 = inlined_call_operand.vmem [shape: bf16[2,4,7,8], index: 0, kind: input, shape index: {}]   ;;  %s1607_s1 = inlined_call_operand.vmem [shape: bf16[8,7], index: 1, kind: input, shape index: {}]   ;;  %s1608_s2 = inlined_call_operand.vmem [shape: f32[8,1], index: 2, kind: input, shape index: {}]   ;;  %s1609_s3 = inlined_call_operand.vmem [shape: bf16[16,8], index: 3, kind: input, shape index: {}]   ;;  %s1610_s4 = inlined_call_operand.vmem [shape: f32[16,1], index: 4, kind: input, shape index: {}]   ;;  %s1611_s5 = inlined_call_operand.vmem [shape: bf16[2,8,7,8], index: 5, kind: input, shape index: {}]   ;;  %s1612_s6 = inlined_call_operand.vmem [shape: bf16[8,7], index: 6, kind: input, shape index: {}]   ;;  %s1613_s7 = inlined_call_operand.vmem [shape: f32[8,1], index: 7, kind: input, shape index: {}]   ;;  %s1614_s8 = inlined_call_operand.vmem [shape: bf16[32,8], index: 8, kind: input, shape index: {}]   ;;  %s1615_s9 = inlined_call_operand.vmem [shape: f32[32,1], index: 9, kind: input, shape index: {}]   ;;  %s1616_s10 = inlined_call_operand.vmem [shape: f32[2,48,8], index: 10, kind: output, shape index: {}]  }
   0x1   :  { %s1364_s15 = smov 0  }
   0x2 LB: > { %s32_s16 = sadd.s32 1, %s1297_s14  ;;  %p1182_p0 = scmp.ge.s32.totalorder %s1301_s15, 1  ;;  %s1301_s15 = sphi %s1364_s15, %s20_s15   ;;  %s1297_s14 = sphi %s1362_s14, %s1618_s14   ;;  %s1293_s13 = sphi %s1360_s13, %s1617_s13  }
   0x3   : > { %p34_p1 = scmp.ge.s32.totalorder %s32_s16, 2  ;;  %p346_p2 = scmp.lt.s32.totalorder %s1301_s15, 3 }
   0x5   : > { %s1620_s16 = smov (%p34_p1, %s32_s16), 0  ;;  %p347_p3 = pnand %p1182_p0, %p346_p2 }
   0x6   : > { %p398_p4 = scmp.lt.s32.totalorder (!%p347_p3), %s1293_s13, 1 }
   0x7   : > { %350 = sbr.rel (%p347_p3) target bundleno = 704 (0x2c0), region = 60 }
   0xc   : > { %v424_v0 = vld [vmem:[%s1608_s2] sm:$0xff]  ;;  %vm449_vm0 = vcmask 1042432   ;;  %v1303_v1 = vmov 0   ;;  %vm450_vm1 = vcmask 1043456   ;;  %v1304_v2 = vmov 65535   ;;  %s1622_s13 = smov (!%p398_p4, %s1293_s13), 1 }
   0xd   : > { %1276 = vset.pattern.permute.xlu0 %v1303_v1  ;;  %v451_v3 = vsel %vm449_vm0, 4294967295, %v1304_v2  ;;  %1277 = vset.pattern.permute.xlu1 %v1303_v1  ;;  %s1244_s19 = sshll.u32 %s1622_s13, 4  ;;  %s1245_s20 = sshll.u32 %s1622_s13, 5  ;;  %v625_v7 = vld [vmem:[%s1613_s7] sm:$0xff]  ;;  %vm445_vm2 = vcmask 56320   ;;  %v636_v26 = vld [vmem:[%s1615_s9 + $0x8] sm:$0xff] }
   0xe   : > { %427 = vperm.xlu0 %1276, %v424_v0   ;;  %1278 = vset.pattern.permute.xlu2 %v1303_v1  ;;  %v1386_v4 = vsel %vm450_vm1, %v451_v3, 0  ;;  %s405_s23 = scalar_lea.vmem %s1606_s0, %s1244_s19  ;;  %s1394_s26 = scalar_lea.vmem %s1611_s5, %s1245_s20  ;;  %v423_v16 = vld [vmem:[%s1607_s1] sm:$0xf]  ;;  %v433_v31 = vld [vmem:[%s1610_s4 + $0x8] sm:$0xff]  ;;  %vm476_vm3 = vcmask 64512  }
   0xf   : > { %v444_v5 = vld [vmem:[%s405_s23] sm:$0xf]  ;;  %v1194_v6 = vld [vmem:[%s405_s23 + $0x4] sm:$0xf]  ;;  %v1197_v10 = vld [vmem:[%s405_s23 + $0x8] sm:$0xf] }
  0x10   : > { %v454_v8 = vand.u32 %v1386_v4, %v444_v5  ;;  %v502_v9 = vand.u32 %v1194_v6, %v1386_v4  ;;  %v1200_v11 = vld [vmem:[%s405_s23 + $0xc] sm:$0xf]  ;;  %v659_v12 = vld [vmem:[%s1394_s26] sm:$0xf]  ;;  %v543_v13 = vand.u32 %v1197_v10, %v1386_v4  ;;  %v1214_v15 = vld [vmem:[%s1394_s26 + $0x4] sm:$0xf] }
  0x11   : > { %v584_v14 = vand.u32 %v1200_v11, %v1386_v4  ;;  %v664_v17 = vand.u32 %v659_v12, %v1386_v4  ;;  %v726_v18 = vand.u32 %v1214_v15, %v1386_v4  ;;  %v432_v19 = vld [vmem:[%s1610_s4] sm:$0xff]  ;;  %v1218_v20 = vld [vmem:[%s1394_s26 + $0x8] sm:$0xf]  ;;  %v1222_v22 = vld [vmem:[%s1394_s26 + $0xc] sm:$0xf]  ;;  %s1249_s20 = smul.u32 48, %s1622_s13 }
  0x12   : > { %463 = vmatpush.bf16.msra.mxu0 %v454_v8  ;;  %511 = vmatpush.bf16.msra.mxu2 %v502_v9  ;;  %v776_v21 = vand.u32 %v1218_v20, %v1386_v4  ;;  %v1423_v23 = vld [vmem:[%s1612_s6] sm:$0xf]  ;;  %v826_v24 = vand.u32 %v1222_v22, %v1386_v4  ;;  %v1226_v0 = vld [vmem:[%s1394_s26 + $0x10] sm:$0xf]  ;;  %v1230_v9 = vld [vmem:[%s1394_s26 + $0x14] sm:$0xf] }
  0x13   : > { %v635_v25 = vld [vmem:[%s1615_s9] sm:$0xff]  ;;  %v876_v3 = vand.u32 %v1226_v0, %v1386_v4  ;;  %v926_v12 = vand.u32 %v1230_v9, %v1386_v4  ;;  %s1516_s23 = scalar_lea.vmem %s1616_s10, %s1249_s20 }
  0x14   : > { %641 = vperm.xlu1 %1277, %v635_v25   ;;  %v1246_v36 = vld [vmem:[%s1609_s3] sm:$0xff]  ;;  %v637_v25 = vld [vmem:[%s1615_s9 + $0x10] sm:$0xff] }
  0x15   : > { %1188 = vmatmul.msk.bf16.vlgmr.msra.gmra.mxu0 %vm445_vm2, %v423_v16  ;;  %1195 = vmatmul.msk.bf16.vlgmr.msra.gmra.mxu2 %vm445_vm2, %v423_v16  ;;  %v1461_v62 = vld [vmem:[%s1614_s8] sm:$0xff] }
  0x16   : > { %628 = vperm.xlu0 %1276, %v625_v7   ;;  %552 = vmatpush.bf16.msrb.mxu0 %v543_v13 }
  0x17   : > { %593 = vmatpush.bf16.msrb.mxu2 %v584_v14  ;;  %v1476_v14 = vld [vmem:[%s1614_s8 + $0x8] sm:$0xff]  ;;  %651 = vperm.xlu2 %1278, %v637_v25  }
  0x1a   : > { %673 = vmatpush.bf16.msra.mxu0 %v664_v17 }
  0x1b   : > { %735 = vmatpush.bf16.msra.mxu2 %v726_v18  ;;  %v1234_v18 = vld [vmem:[%s1394_s26 + $0x18] sm:$0xf] }
  0x1c   : > { %646 = vperm.xlu1 %1277, %v636_v26   ;;  %v638_v26 = vld [vmem:[%s1615_s9 + $0x18] sm:$0xff] }
  0x1e   : > { %436 = vperm.xlu0 %1276, %v432_v19  }
  0x1f   : > { %656 = vperm.xlu2 %1278, %v638_v26  }
  0x24   : > { %441 = vperm.xlu1 %1277, %v433_v31  }
  0x25   : > { %1198 = vmatmul.msk.bf16.vlgmr.msrb.gmra.mxu0 %vm445_vm2, %v423_v16  ;;  %1201 = vmatmul.msk.bf16.vlgmr.msrb.gmra.mxu2 %vm445_vm2, %v423_v16 }
  0x26   : > { %785 = vmatpush.bf16.msrb.mxu0 %v776_v21  ;;  %v976_v21 = vand.u32 %v1234_v18, %v1386_v4 }
  0x35   : > { %1203 = vmatmul.msk.bf16.vlgmr.msra.gmra.mxu0 %vm445_vm2, %v1423_v23  ;;  %1215 = vmatmul.msk.bf16.vlgmr.msra.gmra.mxu2 %vm445_vm2, %v1423_v23 }
  0x36   : > { %835 = vmatpush.bf16.msra.mxu0 %v826_v24 }
  0x45   : > { %1219 = vmatmul.msk.bf16.vlgmr.msrb.gmra.mxu0 %vm445_vm2, %v1423_v23 }
  0x55   : > { %1223 = vmatmul.msk.bf16.vlgmr.msra.gmra.mxu0 %vm445_vm2, %v1423_v23 }
  0x80   : > { %v428_v27 = vpop.permute.xlu0 %427 }
  0x88   : > { %v1453_v54 = vpop.permute.xlu0 %628 }
  0x92   : > { %v465_v28 = vpop.f32.mrf.mxu0 }
  0x93   : > { %v466_v29 = vadd.f32 %v465_v28, %v428_v27 }
  0x95   : > { %v469_v30 = vmax.f32 %v466_v29, 0.0  ;;  %v1508_v29 = vpop.permute.xlu1 %641 }
  0x97   : > { %v470_v32 = vpack.c.bf16 %v469_v30, %v469_v30 }
  0x98   : > { %v513_v33 = vpop.f32.mrf.mxu2 }
  0x99   : > { %v514_v34 = vadd.f32 %v513_v33, %v428_v27  ;;  %v481_v35 = vsel %vm450_vm1, %v470_v32, 0 }
  0x9a   : > { %v467_v37 = vpop.f32.mrf.mxu0  ;;  %490 = vmatpush.bf16.msra.mxu3 %v481_v35 }
  0x9b   : > { %v517_v38 = vmax.f32 %v514_v34, 0.0  ;;  %v437_v34 = vpop.permute.xlu0 %436 }
  0x9d   : > { %v518_v39 = vpack.c.bf16 %v517_v38, %v517_v38  ;;  %1193 = vmatmul.msk.bf16.vlgmr.msra.gmra.mxu3 %vm476_vm3, %v1246_v36  ;;  %v1510_v33 = vpop.permute.xlu1 %646 }
  0x9f   : > { %v520_v40 = vsel %vm450_vm1, %v518_v39, 0 }
  0xa0   : > { %v515_v41 = vpop.f32.mrf.mxu2  ;;  %529 = vmatpush.bf16.msrb.mxu3 %v520_v40 }
  0xa2   : > { %v554_v42 = vpop.f32.mrf.mxu0 }
  0xa3   : > { %v555_v43 = vadd.f32 %v554_v42, %v428_v27 }
  0xa5   : > { %v558_v44 = vmax.f32 %v555_v43, 0.0  ;;  %v442_v42 = vpop.permute.xlu1 %441 }
  0xa7   : > { %v559_v45 = vpack.c.bf16 %v558_v44, %v558_v44 }
  0xa8   : > { %v595_v46 = vpop.f32.mrf.mxu2 }
  0xa9   : > { %v596_v47 = vadd.f32 %v595_v46, %v428_v27  ;;  %v561_v48 = vsel %vm450_vm1, %v559_v45, 0 }
  0xaa   : > { %v556_v49 = vpop.f32.mrf.mxu0  ;;  %570 = vmatpush.bf16.msra.mxu1 %v561_v48 }
  0xab   : > { %v599_v50 = vmax.f32 %v596_v47, 0.0 }
  0xad   : > { %v600_v51 = vpack.c.bf16 %v599_v50, %v599_v50  ;;  %1196 = vmatmul.msk.bf16.vlgmr.msrb.gmra.mxu3 %vm476_vm3, %v1246_v36  ;;  %1199 = vmatmul.msk.bf16.vlgmr.msra.gmra.mxu1 %vm476_vm3, %v1246_v36 }
  0xaf   : > { %v602_v52 = vsel %vm450_vm1, %v600_v51, 0 }
  0xb0   : > { %v597_v53 = vpop.f32.mrf.mxu2  ;;  %611 = vmatpush.bf16.msra.mxu3 %v602_v52 }
  0xb2   : > { %v675_v55 = vpop.f32.mrf.mxu0 }
  0xb3   : > { %v676_v56 = vadd.f32 %v675_v55, %v1453_v54 }
  0xb5   : > { %v679_v57 = vmax.f32 %v676_v56, 0.0 }
  0xb7   : > { %v680_v58 = vpack.c.bf16 %v679_v57, %v679_v57 }
  0xb8   : > { %v737_v59 = vpop.f32.mrf.mxu2 }
  0xb9   : > { %v738_v60 = vadd.f32 %v737_v59, %v1453_v54  ;;  %v698_v61 = vsel %vm450_vm1, %v680_v58, 0 }
  0xba   : > { %v677_v63 = vpop.f32.mrf.mxu0  ;;  %707 = vmatpush.bf16.msrb.mxu1 %v698_v61 }
  0xbb   : > { %v741_v1 = vmax.f32 %v738_v60, 0.0 }
  0xbd   : > { %v742_v2 = vpack.c.bf16 %v741_v1, %v741_v1  ;;  %1202 = vmatmul.msk.bf16.vlgmr.msra.gmra.mxu3 %vm476_vm3, %v1246_v36  ;;  %1212 = vmatmul.msk.bf16.vlgmr.msrb.gmra.mxu1 %vm476_vm3, %v1461_v62 }
  0xbf   : > { %v744_v5 = vsel %vm450_vm1, %v742_v2, 0 }
  0xc0   : > { %753 = vmatpush.bf16.msrb.mxu3 %v744_v5  ;;  %v739_v6 = vpop.f32.mrf.mxu2 }
  0xc2   : > { %v787_v7 = vpop.f32.mrf.mxu0 }
  0xc3   : > { %v788_v8 = vadd.f32 %v787_v7, %v1453_v54 }
  0xc4   : > { %885 = vmatpush.bf16.msra.mxu3 %v876_v3 }
  0xc5   : > { %v791_v10 = vmax.f32 %v788_v8, 0.0 }
  0xc7   : > { %v792_v11 = vpack.c.bf16 %v791_v10, %v791_v10 }
  0xc9   : > { %v794_v13 = vsel %vm450_vm1, %v792_v11, 0 }
  0xca   : > { %v789_v15 = vpop.f32.mrf.mxu0  ;;  %803 = vmatpush.bf16.msrb.mxu2 %v794_v13 }
  0xcd   : > { %1213 = vmatmul.msk.bf16.gmra.mxu1 %vm476_vm3, %v1476_v14  ;;  %1216 = vmatmul.msk.bf16.vlgmr.msrb.gmra.mxu3 %vm476_vm3, %v1461_v62 }
  0xce   : > { %935 = vmatpush.bf16.msra.mxu2 %v926_v12 }
  0xcf   : > { %1220 = vmatmul.msk.bf16.vlgmr.msrb.gmra.mxu2 %vm476_vm3, %v1461_v62 }
  0xd2   : > { %v837_v16 = vpop.f32.mrf.mxu0 }
  0xd3   : > { %v838_v17 = vadd.f32 %v837_v16, %v1453_v54 }
  0xd5   : > { %v841_v19 = vmax.f32 %v838_v17, 0.0  ;;  %v1526_v17 = vpop.permute.xlu2 %651 }
  0xd7   : > { %v842_v20 = vpack.c.bf16 %v841_v19, %v841_v19 }
  0xd9   : > { %v844_v22 = vsel %vm450_vm1, %v842_v20, 0 }
  0xda   : > { %853 = vmatpush.bf16.msra.mxu1 %v844_v22  ;;  %v839_v24 = vpop.f32.mrf.mxu0 }
  0xdd   : > { %1217 = vmatmul.msk.bf16.gmra.mxu3 %vm476_vm3, %v1476_v14  ;;  %1224 = vmatmul.msk.bf16.vlgmr.msra.gmra.mxu1 %vm476_vm3, %v1461_v62 }
  0xde   : > { %985 = vmatpush.bf16.msrb.mxu1 %v976_v21 }
  0xdf   : > { %1221 = vmatmul.msk.bf16.gmra.mxu2 %vm476_vm3, %v1476_v14 }
  0xed   : > { %1225 = vmatmul.msk.bf16.gmra.mxu1 %vm476_vm3, %v1476_v14  ;;  %1227 = vmatmul.msk.bf16.vlgmr.msra.gmra.mxu3 %vm445_vm2, %v1423_v23 }
  0xef   : > { %1231 = vmatmul.msk.bf16.vlgmr.msra.gmra.mxu2 %vm445_vm2, %v1423_v23 }
  0xfd   : > { %1235 = vmatmul.msk.bf16.vlgmr.msrb.gmra.mxu1 %vm445_vm2, %v1423_v23 }
 0x120   : > { %v492_v27 = vpop.f32.mrf.mxu3 }
 0x121   : > { %v493_v37 = vadd.f32 %v492_v27, %v437_v34 }
 0x123   : > { %v497_v40 = vmax.f32 %v493_v37, 0.0 }
 0x128   : > { %v494_v28 = vpop.f32.mrf.mxu3 }
 0x129   : > { %v495_v46 = vadd.f32 %v494_v28, %v442_v42 }
 0x12a   : > { %v572_v30 = vpop.f32.mrf.mxu1 }
 0x12b   : > { %v573_v41 = vadd.f32 %v572_v30, %v437_v34  ;;  %v498_v55 = vmax.f32 %v495_v46, 0.0 }
 0x12d   : > { %v577_v47 = vmax.f32 %v573_v41, 0.0 }
 0x130   : > { %v531_v31 = vpop.f32.mrf.mxu3 }
 0x131   : > { %v532_v35 = vadd.f32 %v531_v31, %v437_v34 }
 0x132   : > { %v574_v32 = vpop.f32.mrf.mxu1 }
 0x133   : > { %v536_v39 = vmax.f32 %v532_v35, 0.0  ;;  %v575_v50 = vadd.f32 %v574_v32, %v442_v42 }
 0x135   : > { %v538_v43 = vmax.f32 %v497_v40, %v536_v39  ;;  %v578_v57 = vmax.f32 %v575_v50, 0.0  ;;  %v1536_v40 = vpop.permute.xlu2 %656 }
 0x137   : > { %v579_v52 = vmax.f32 %v538_v43, %v577_v47 }
 0x138   : > { %v533_v36 = vpop.f32.mrf.mxu3 }
 0x139   : > { %v534_v44 = vadd.f32 %v533_v36, %v442_v42 }
 0x13a   : > { %v709_v38 = vpop.f32.mrf.mxu1 }
 0x13b   : > { %v537_v51 = vmax.f32 %v534_v44, 0.0  ;;  %v710_v1 = vadd.f32 %v709_v38, %v1508_v29 }
 0x13d   : > { %v539_v58 = vmax.f32 %v498_v55, %v537_v51  ;;  %v719_v5 = vmax.f32 %v710_v1, 0.0 }
 0x13f   : > { %v580_v63 = vmax.f32 %v539_v58, %v578_v57 }
 0x140   : > { %v613_v45 = vpop.f32.mrf.mxu3 }
 0x141   : > { %v614_v48 = vadd.f32 %v613_v45, %v437_v34 }
 0x142   : > { %v711_v49 = vpop.f32.mrf.mxu1 }
 0x143   : > { %v618_v53 = vmax.f32 %v614_v48, 0.0  ;;  %v712_v12 = vadd.f32 %v711_v49, %v1510_v33 }
 0x145   : > { %v620_v56 = vmax.f32 %v579_v52, %v618_v53  ;;  %v720_v18 = vmax.f32 %v712_v12, 0.0 }
 0x147   : > { %622 = vst.msk [vmem:[%s1516_s23] sm:$0xff] %vm476_vm3, %v620_v56 }
 0x148   : > { %v615_v59 = vpop.f32.mrf.mxu3 }
 0x149   : > { %v616_v60 = vadd.f32 %v615_v59, %v442_v42 }
 0x14a   : > { %v714_v61 = vpop.f32.mrf.mxu1 }
 0x14b   : > { %v619_v0 = vmax.f32 %v616_v60, 0.0  ;;  %v715_v30 = vadd.f32 %v714_v61, %v1526_v17 }
 0x14d   : > { %v621_v2 = vmax.f32 %v580_v63, %v619_v0  ;;  %v721_v35 = vmax.f32 %v715_v30, 0.0 }
 0x14f   : > { %623 = vst.msk [vmem:[%s1516_s23 + $0x8] sm:$0xff] %vm476_vm3, %v621_v2 }
 0x150   : > { %v755_v3 = vpop.f32.mrf.mxu3 }
 0x151   : > { %v756_v6 = vadd.f32 %v755_v3, %v1508_v29 }
 0x152   : > { %v805_v7 = vpop.f32.mrf.mxu2  ;;  %v716_v9 = vpop.f32.mrf.mxu1 }
 0x153   : > { %v806_v8 = vadd.f32 %v805_v7, %v1508_v29  ;;  %v765_v10 = vmax.f32 %v756_v6, 0.0  ;;  %v717_v46 = vadd.f32 %v716_v9, %v1536_v40  ;;  %v1238_v6 = vld [vmem:[%s1394_s26 + $0x1c] sm:$0xf] }
 0x154   : > { %v1026_v12 = vand.u32 %v1238_v6, %v1386_v4 }
 0x155   : > { %v815_v11 = vmax.f32 %v806_v8, 0.0  ;;  %v769_v13 = vmax.f32 %v719_v5, %v765_v10  ;;  %v722_v50 = vmax.f32 %v717_v46, 0.0 }
 0x157   : > { %v819_v15 = vmax.f32 %v769_v13, %v815_v11 }
 0x158   : > { %v757_v16 = vpop.f32.mrf.mxu3 }
 0x159   : > { %v758_v19 = vadd.f32 %v757_v16, %v1510_v33 }
 0x15a   : > { %v807_v20 = vpop.f32.mrf.mxu2  ;;  %v855_v22 = vpop.f32.mrf.mxu1 }
 0x15b   : > { %v808_v21 = vadd.f32 %v807_v20, %v1510_v33  ;;  %v766_v24 = vmax.f32 %v758_v19, 0.0  ;;  %v856_v25 = vadd.f32 %v855_v22, %v1508_v29 }
 0x15d   : > { %v816_v26 = vmax.f32 %v808_v21, 0.0  ;;  %v770_v27 = vmax.f32 %v720_v18, %v766_v24  ;;  %v865_v28 = vmax.f32 %v856_v25, 0.0 }
 0x15f   : > { %v820_v31 = vmax.f32 %v770_v27, %v816_v26  ;;  %v1532_v32 = vmax.f32 %v819_v15, %v865_v28 }
 0x160   : > { %v760_v34 = vpop.f32.mrf.mxu3 }
 0x161   : > { %v761_v36 = vadd.f32 %v760_v34, %v1526_v17 }
 0x162   : > { %v810_v37 = vpop.f32.mrf.mxu2  ;;  %v857_v39 = vpop.f32.mrf.mxu1 }
 0x163   : > { %v811_v38 = vadd.f32 %v810_v37, %v1526_v17  ;;  %v767_v41 = vmax.f32 %v761_v36, 0.0  ;;  %v858_v42 = vadd.f32 %v857_v39, %v1510_v33 }
 0x165   : > { %v817_v43 = vmax.f32 %v811_v38, 0.0  ;;  %v771_v44 = vmax.f32 %v721_v35, %v767_v41  ;;  %v866_v45 = vmax.f32 %v858_v42, 0.0 }
 0x167   : > { %v821_v47 = vmax.f32 %v771_v44, %v817_v43  ;;  %v870_v48 = vmax.f32 %v820_v31, %v866_v45 }
 0x168   : > { %v762_v49 = vpop.f32.mrf.mxu3 }
 0x169   : > { %v763_v51 = vadd.f32 %v762_v49, %v1536_v40 }
 0x16a   : > { %v812_v52 = vpop.f32.mrf.mxu2  ;;  %v860_v55 = vpop.f32.mrf.mxu1 }
 0x16b   : > { %v813_v53 = vadd.f32 %v812_v52, %v1536_v40  ;;  %v768_v56 = vmax.f32 %v763_v51, 0.0  ;;  %v861_v57 = vadd.f32 %v860_v55, %v1526_v17 }
 0x16d   : > { %v818_v58 = vmax.f32 %v813_v53, 0.0  ;;  %v772_v59 = vmax.f32 %v722_v50, %v768_v56  ;;  %v867_v60 = vmax.f32 %v861_v57, 0.0 }
 0x16f   : > { %v822_v61 = vmax.f32 %v772_v59, %v818_v58  ;;  %v871_v63 = vmax.f32 %v821_v47, %v867_v60 }
 0x170   : > { %v887_v0 = vpop.f32.mrf.mxu3 }
 0x171   : > { %v888_v1 = vadd.f32 %v887_v0, %v1453_v54 }
 0x172   : > { %v937_v2 = vpop.f32.mrf.mxu2  ;;  %v862_v5 = vpop.f32.mrf.mxu1 }
 0x173   : > { %v938_v3 = vadd.f32 %v937_v2, %v1453_v54  ;;  %v891_v7 = vmax.f32 %v888_v1, 0.0  ;;  %v863_v8 = vadd.f32 %v862_v5, %v1536_v40 }
 0x175   : > { %v941_v9 = vmax.f32 %v938_v3, 0.0  ;;  %v892_v10 = vpack.c.bf16 %v891_v7, %v891_v7  ;;  %v868_v11 = vmax.f32 %v863_v8, 0.0 }
 0x177   : > { %v942_v13 = vpack.c.bf16 %v941_v9, %v941_v9  ;;  %v872_v15 = vmax.f32 %v822_v61, %v868_v11  ;;  %v894_v16 = vsel %vm450_vm1, %v892_v10, 0 }
 0x178   : > { %v889_v18 = vpop.f32.mrf.mxu3  ;;  %903 = vmatpush.bf16.msrb.mxu0 %v894_v16 }
 0x179   : > { %v944_v19 = vsel %vm450_vm1, %v942_v13, 0 }
 0x17a   : > { %953 = vmatpush.bf16.msrb.mxu3 %v944_v19  ;;  %v939_v20 = vpop.f32.mrf.mxu2  ;;  %v987_v21 = vpop.f32.mrf.mxu1 }
 0x17b   : > { %v988_v22 = vadd.f32 %v987_v21, %v1453_v54  ;;  %1228 = vmatmul.msk.bf16.vlgmr.msrb.gmra.mxu0 %vm476_vm3, %v1461_v62 }
 0x17c   : > { %1035 = vmatpush.bf16.msra.mxu0 %v1026_v12 }
 0x17d   : > { %1232 = vmatmul.msk.bf16.vlgmr.msrb.gmra.mxu3 %vm476_vm3, %v1461_v62  ;;  %v991_v4 = vmax.f32 %v988_v22, 0.0 }
 0x17f   : > { %v992_v24 = vpack.c.bf16 %v991_v4, %v991_v4 }
 0x181   : > { %v994_v25 = vsel %vm450_vm1, %v992_v24, 0 }
 0x182   : > { %1003 = vmatpush.bf16.msrb.mxu2 %v994_v25  ;;  %v989_v26 = vpop.f32.mrf.mxu1 }
 0x185   : > { %1236 = vmatmul.msk.bf16.vlgmr.msrb.gmra.mxu2 %vm476_vm3, %v1461_v62 }
 0x18b   : > { %1229 = vmatmul.msk.bf16.gmra.mxu0 %vm476_vm3, %v1476_v14 }
 0x18d   : > { %1233 = vmatmul.msk.bf16.gmra.mxu3 %vm476_vm3, %v1476_v14 }
 0x195   : > { %1237 = vmatmul.msk.bf16.gmra.mxu2 %vm476_vm3, %v1476_v14 }
 0x19b   : > { %1239 = vmatmul.msk.bf16.vlgmr.msra.gmra.mxu0 %vm445_vm2, %v1423_v23 }
 0x1f8   : > { %v905_v27 = vpop.f32.mrf.mxu0 }
 0x1f9   : > { %v906_v28 = vadd.f32 %v905_v27, %v1508_v29 }
 0x1fb   : > { %v915_v30 = vmax.f32 %v906_v28, 0.0 }
 0x1fd   : > { %v919_v31 = vmax.f32 %v1532_v32, %v915_v30 }
 0x200   : > { %v907_v34 = vpop.f32.mrf.mxu0 }
 0x201   : > { %v908_v35 = vadd.f32 %v907_v34, %v1510_v33 }
 0x203   : > { %v916_v36 = vmax.f32 %v908_v35, 0.0 }
 0x205   : > { %v920_v37 = vmax.f32 %v870_v48, %v916_v36  ;;  %v955_v48 = vpop.f32.mrf.mxu3 }
 0x206   : > { %v956_v53 = vadd.f32 %v955_v48, %v1508_v29 }
 0x208   : > { %v910_v38 = vpop.f32.mrf.mxu0  ;;  %v1005_v52 = vpop.f32.mrf.mxu2  ;;  %v965_v57 = vmax.f32 %v956_v53, 0.0 }
 0x209   : > { %v911_v39 = vadd.f32 %v910_v38, %v1526_v17  ;;  %v1006_v56 = vadd.f32 %v1005_v52, %v1508_v29 }
 0x20a   : > { %v969_v60 = vmax.f32 %v919_v31, %v965_v57 }
 0x20b   : > { %v917_v41 = vmax.f32 %v911_v39, 0.0  ;;  %v1015_v58 = vmax.f32 %v1006_v56, 0.0 }
 0x20d   : > { %v921_v42 = vmax.f32 %v871_v63, %v917_v41  ;;  %v957_v55 = vpop.f32.mrf.mxu3  ;;  %v1019_v63 = vmax.f32 %v969_v60, %v1015_v58 }
 0x20e   : > { %v958_v61 = vadd.f32 %v957_v55, %v1510_v33 }
 0x210   : > { %v912_v43 = vpop.f32.mrf.mxu0  ;;  %v966_v2 = vmax.f32 %v958_v61, 0.0 }
 0x211   : > { %v913_v44 = vadd.f32 %v912_v43, %v1536_v40 }
 0x212   : > { %v970_v8 = vmax.f32 %v920_v37, %v966_v2 }
 0x213   : > { %v918_v23 = vmax.f32 %v913_v44, 0.0 }
 0x215   : > { %v922_v45 = vmax.f32 %v872_v15, %v918_v23  ;;  %v960_v1 = vpop.f32.mrf.mxu3 }
 0x216   : > { %v961_v9 = vadd.f32 %v960_v1, %v1526_v17 }
 0x218   : > { %v1037_v46 = vpop.f32.mrf.mxu0  ;;  %v967_v13 = vmax.f32 %v961_v9, 0.0 }
 0x219   : > { %v1038_v47 = vadd.f32 %v1037_v46, %v1453_v54  ;;  %v1007_v54 = vpop.f32.mrf.mxu2 }
 0x21a   : > { %v971_v21 = vmax.f32 %v921_v42, %v967_v13 }
 0x21b   : > { %v1041_v49 = vmax.f32 %v1038_v47, 0.0 }
 0x21d   : > { %v1042_v32 = vpack.c.bf16 %v1041_v49, %v1041_v49  ;;  %v962_v16 = vpop.f32.mrf.mxu3 }
 0x21e   : > { %v963_v22 = vadd.f32 %v962_v16, %v1536_v40 }
 0x21f   : > { %v1044_v50 = vsel %vm450_vm1, %v1042_v32, 0 }
 0x220   : > { %v1039_v51 = vpop.f32.mrf.mxu0  ;;  %1053 = vmatpush.bf16.msra.mxu1 %v1044_v50  ;;  %v968_v26 = vmax.f32 %v963_v22, 0.0 }
 0x221   : > { %v1010_v5 = vpop.f32.mrf.mxu2 }
 0x222   : > { %v972_v31 = vmax.f32 %v922_v45, %v968_v26 }
 0x223   : > { %1240 = vmatmul.msk.bf16.vlgmr.msra.gmra.mxu1 %vm476_vm3, %v1461_v62 }
 0x229   : > { %v1012_v19 = vpop.f32.mrf.mxu2 }
 0x22a   : > { %v1013_v24 = vadd.f32 %v1012_v19, %v1536_v40 }
 0x22c   : > { %v1018_v28 = vmax.f32 %v1013_v24, 0.0 }
 0x22e   : > { %v1022_v35 = vmax.f32 %v972_v31, %v1018_v28 }
 0x233   : > { %1241 = vmatmul.msk.bf16.gmra.mxu1 %vm476_vm3, %v1476_v14  ;;  %v1008_v14 = vadd.f32 %v1007_v54, %v1510_v33 }
 0x235   : > { %v1016_v6 = vmax.f32 %v1008_v14, 0.0 }
 0x237   : > { %v1020_v11 = vmax.f32 %v970_v8, %v1016_v6 }
 0x2a0   : > { %v1055_v59 = vpop.f32.mrf.mxu1 }
 0x2a1   : > { %v1056_v62 = vadd.f32 %v1055_v59, %v1508_v29  ;;  %v1011_v29 = vadd.f32 %v1010_v5, %v1526_v17 }
 0x2a3   : > { %v1065_v0 = vmax.f32 %v1056_v62, 0.0  ;;  %v1017_v18 = vmax.f32 %v1011_v29, 0.0 }
 0x2a5   : > { %v1069_v3 = vmax.f32 %v1019_v63, %v1065_v0 }
 0x2a7   : > { %1073 = vst.msk [vmem:[%s1516_s23 + $0x10] sm:$0xff] %vm476_vm3, %v1069_v3 }
 0x2a8   : > { %v1057_v7 = vpop.f32.mrf.mxu1 }
 0x2a9   : > { %v1058_v10 = vadd.f32 %v1057_v7, %v1510_v33  ;;  %v1021_v33 = vmax.f32 %v971_v21, %v1017_v18 }
 0x2ab   : > { %v1066_v12 = vmax.f32 %v1058_v10, 0.0 }
 0x2ad   : > { %v1070_v15 = vmax.f32 %v1020_v11, %v1066_v12 }
 0x2af   : > { %1074 = vst.msk [vmem:[%s1516_s23 + $0x18] sm:$0xff] %vm476_vm3, %v1070_v15 }
 0x2b0   : > { %v1060_v20 = vpop.f32.mrf.mxu1 }
 0x2b1   : > { %v1061_v4 = vadd.f32 %v1060_v20, %v1526_v17 }
 0x2b3   : > { %v1067_v25 = vmax.f32 %v1061_v4, 0.0 }
 0x2b5   : > { %v1071_v27 = vmax.f32 %v1021_v33, %v1067_v25 }
 0x2b7   : > { %1075 = vst.msk [vmem:[%s1516_s23 + $0x20] sm:$0xff] %vm476_vm3, %v1071_v27 }
 0x2b8   : > { %v1062_v30 = vpop.f32.mrf.mxu1 }
 0x2b9   : > { %v1063_v34 = vadd.f32 %v1062_v30, %v1536_v40 }
 0x2bb   : > { %v1068_v36 = vmax.f32 %v1063_v34, 0.0 }
 0x2bd   : > { %v1072_v37 = vmax.f32 %v1022_v35, %v1068_v36 }
 0x2bf   : > { %1076 = vst.msk [vmem:[%s1516_s23 + $0x28] sm:$0xff] %vm476_vm3, %v1072_v37 }
 0x2c0 PF: > { %s20_s15 = sadd.s32 1, %s1301_s15   ;;  %s1617_s13 = smov %s1297_s14 }
 0x2c1   : > { %p17_p5 = scmp.ge.s32.totalorder %s20_s15, 4   ;;  %s1618_s14 = smov %s1620_s16 }
 0x2c3   :  { %19 = sbr.rel (!%p17_p5) target bundleno = 2 (0x2), region = 103 }

</bundles_post_ra>
